<compile_context>
chip_gen: v6e
topology: v6e:2x2x1
jax: 0.10.0
libtpu: 0.0.40
codegen_flags: <defaults>
</compile_context>

<pallas_src>
import jax
import jax.numpy as jnp
from jax.experimental import pallas as pl
from jax.experimental.pallas import tpu as pltpu

_HIDDEN = 8
_LANES = 128
_SUBLANES = 8
_MAX_TILE_ROWS = 4096      # 2 MiB f32 per block; safe on v5e/v6e/v7x scoped VMEM
_PALLAS_MIN_BATCH = 4096   # below this, fixed launch/layout overhead dominates


def _round_up(n, m):
    return ((n + m - 1) // m) * m


def _compute_dtype():
    """bf16 packed-VPU math on v6e / v7x; f32 elsewhere (v5e has no bf16 VPU)."""
    try:
        kind = jax.devices()[0].device_kind.lower()
    except Exception:
        return jnp.float32
    if ("v6" in kind) or ("v7" in kind) or ("tpu7" in kind):
        return jnp.bfloat16
    return jnp.float32


def _pick_tile(rows):
    """Row tile: as large as VMEM comfortably allows, multiple of 8, and
    giving >= 2 grid steps when possible (so v7x's two TCs both get work)."""
    if rows <= _SUBLANES:
        return rows                                   # single full-extent block
    tb = min(_MAX_TILE_ROWS, rows)
    if tb != rows:
        tb = (tb // _SUBLANES) * _SUBLANES
    if rows >= 2 * _SUBLANES and pl.cdiv(rows, tb) < 2:
        tb = _round_up(pl.cdiv(rows, 2), _SUBLANES)
    return tb


def simple_nn_kernel(params_ref, x_ref, o_ref):
    # params_ref: (25,) f32 in SMEM, layout [w1(8) | b1(8) | w2(8) | b2(1)].
    # x_ref: (tb, 128) compute-dtype VMEM.  o_ref: (tb, 128) f32 VMEM.
    cd = x_ref.dtype
    x = x_ref[...]
    w1 = [params_ref[j].astype(cd) for j in range(_HIDDEN)]
    b1 = [params_ref[_HIDDEN + j].astype(cd) for j in range(_HIDDEN)]
    w2 = [params_ref[2 * _HIDDEN + j].astype(cd) for j in range(_HIDDEN)]
    b2 = params_ref[3 * _HIDDEN]          # stays f32; added once in final store

    # Unrolled over 8 hidden units: pure VPU FMAs.  No zero-init of acc.
    acc = jnp.maximum(x * w1[0] + b1[0], 0.0) * w2[0]
    for j in range(1, _HIDDEN):
        acc = acc + jnp.maximum(x * w1[j] + b1[j], 0.0) * w2[j]

    o_ref[...] = acc.astype(jnp.float32) + b2


def _reference_forward(x, fc1_w, fc1_b, fc2_w, fc2_b):
    h = jnp.maximum(x @ fc1_w.T + fc1_b[None, :], 0.0)
    return h @ fc2_w.T + fc2_b[None, :]


def simple_nn_forward(x, fc1_w, fc1_b, fc2_w, fc2_b, *, force_pallas=False):
    """Forward pass of SimpleNN.

    x:      (B, 1) float32
    fc1_w:  (8, 1) float32   (PyTorch nn.Linear weight layout: (out, in))
    fc1_b:  (8,)   float32
    fc2_w:  (1, 8) float32
    fc2_b:  (1,)   float32
    returns (B, 1) float32
    """
    B = x.shape[0]
    if not force_pallas and B < _PALLAS_MIN_BATCH:
        # Launch + layout overhead dominates at small B: plain XLA is faster.
        return _reference_forward(x, fc1_w, fc1_b, fc2_w, fc2_b)

    cd = _compute_dtype()

    # Fuse all 25 parameters into a single f32 vector for SMEM.
    params = jnp.concatenate([
        fc1_w.reshape(_HIDDEN).astype(jnp.float32),
        fc1_b.reshape(_HIDDEN).astype(jnp.float32),
        fc2_w.reshape(_HIDDEN).astype(jnp.float32),
        fc2_b.reshape(1).astype(jnp.float32),
    ])

    # Lane-dense slab.  Aligned fast path: no pad copy, no output slice.
    aligned = (B % _LANES == 0)
    if aligned:
        rows = B // _LANES
        slab = x.reshape(rows, _LANES).astype(cd)
    else:
        rows = _round_up(max(pl.cdiv(B, _LANES), _SUBLANES), _SUBLANES)
        flat = x.reshape(-1).astype(cd)
        slab = jnp.pad(flat, (0, rows * _LANES - B)).reshape(rows, _LANES)

    tb = _pick_tile(rows)
    grid = (pl.cdiv(rows, tb),)

    elems = rows * _LANES
    cost = pl.CostEstimate(
        flops=41 * elems,
        transcendentals=0,
        bytes_accessed=elems * (slab.dtype.itemsize + 4),
    )

    smem_spec = pl.BlockSpec(memory_space=pltpu.MemorySpace.SMEM)
    out_slab = pl.pallas_call(
        simple_nn_kernel,
        out_shape=jax.ShapeDtypeStruct((rows, _LANES), jnp.float32),
        grid=grid,
        in_specs=[
            smem_spec,                                       # fused params
            pl.BlockSpec((tb, _LANES), lambda i: (i, 0)),    # x slab
        ],
        out_specs=pl.BlockSpec((tb, _LANES), lambda i: (i, 0)),
        compiler_params=pltpu.CompilerParams(
            dimension_semantics=("parallel",),
        ),
        cost_estimate=cost,
    )(params, slab)

    if aligned:
        return out_slab.reshape(B, 1)
    # Padded lanes compute garbage-but-finite values; keep this final slice.
    return out_slab.reshape(-1)[:B].reshape(B, 1)


if __name__ == "__main__":
    key = jax.random.PRNGKey(0)
    kw1, kb1, kw2, kb2, kx1, kx2, kx3 = jax.random.split(key, 7)

    # PyTorch nn.Linear weight layout: (out_features, in_features).
    fc1_w = jax.random.normal(kw1, (8, 1), dtype=jnp.float32) * 0.5
    fc1_b = jax.random.normal(kb1, (8,), dtype=jnp.float32) * 0.1
    fc2_w = jax.random.normal(kw2, (1, 8), dtype=jnp.float32) * 0.5
    fc2_b = jax.random.normal(kb2, (1,), dtype=jnp.float32) * 0.1

    use_bf16 = (_compute_dtype() == jnp.bfloat16)
    atol = rtol = 5e-2 if use_bf16 else 1e-5

    # 1) Small batch, forced through the Pallas kernel (ragged padding path).
    batch1 = 8
    x1 = jax.random.normal(kx1, (batch1, 1), dtype=jnp.float32)
    o1 = jax.block_until_ready(
        simple_nn_forward(x1, fc1_w, fc1_b, fc2_w, fc2_b, force_pallas=True))
    r1 = _reference_forward(x1, fc1_w, fc1_b, fc2_w, fc2_b)
    assert o1.shape == (batch1, 1)
    assert jnp.allclose(o1, r1, atol=atol, rtol=rtol)

    # 2) Ragged batch (not a multiple of 128), forced Pallas.
    batch2 = 300
    x2 = jax.random.normal(kx2, (batch2, 1), dtype=jnp.float32)
    o2 = jax.block_until_ready(
        simple_nn_forward(x2, fc1_w, fc1_b, fc2_w, fc2_b, force_pallas=True))
    r2 = _reference_forward(x2, fc1_w, fc1_b, fc2_w, fc2_b)
    assert o2.shape == (batch2, 1)
    assert jnp.allclose(o2, r2, atol=atol, rtol=rtol)

    # 3) Aligned batch via auto-dispatch: no-pad fast path, >= 2 grid steps.
    batch3 = 8192
    x3 = jax.random.normal(kx3, (batch3, 1), dtype=jnp.float32)
    o3 = jax.block_until_ready(
        simple_nn_forward(x3, fc1_w, fc1_b, fc2_w, fc2_b))
    r3 = _reference_forward(x3, fc1_w, fc1_b, fc2_w, fc2_b)
    assert o3.shape == (batch3, 1)
    assert jnp.allclose(o3, r3, atol=atol, rtol=rtol)

    print("KERNEL_OK")
</pallas_src>

<mosaic_0001>
module attributes {stable_mosaic.version = 11 : i64} {
  func.func @simple_nn_kernel(%arg0: i32, %arg1: memref<25xf32, #tpu.memory_space<smem>>, %arg2: memref<8x128xf32, #tpu.memory_space<vmem>>, %arg3: memref<8x128xf32, #tpu.memory_space<vmem>>) attributes {dimension_semantics = [#tpu.dimension_semantics<parallel>], iteration_bounds = array<i64: 1>, scalar_prefetch = 0 : i64, scratch_operands = 0 : i64, tpu.core_type = #tpu.core_type<tc>, window_params = [{transform_indices = @transform_0, window_bounds = array<i64: 25>}, {transform_indices = @transform_1, window_bounds = array<i64: 8, 128>}, {transform_indices = @transform_2, window_bounds = array<i64: 8, 128>}]} {
    %c0 = arith.constant 0 : index
    %c0_0 = arith.constant 0 : index
    %0 = vector.load %arg2[%c0, %c0_0] : memref<8x128xf32, #tpu.memory_space<vmem>>, vector<8x128xf32>
    %c0_1 = arith.constant 0 : index
    %1 = memref.load %arg1[%c0_1] : memref<25xf32, #tpu.memory_space<smem>>
    %c1 = arith.constant 1 : index
    %2 = memref.load %arg1[%c1] : memref<25xf32, #tpu.memory_space<smem>>
    %c2 = arith.constant 2 : index
    %3 = memref.load %arg1[%c2] : memref<25xf32, #tpu.memory_space<smem>>
    %c3 = arith.constant 3 : index
    %4 = memref.load %arg1[%c3] : memref<25xf32, #tpu.memory_space<smem>>
    %c4 = arith.constant 4 : index
    %5 = memref.load %arg1[%c4] : memref<25xf32, #tpu.memory_space<smem>>
    %c5 = arith.constant 5 : index
    %6 = memref.load %arg1[%c5] : memref<25xf32, #tpu.memory_space<smem>>
    %c6 = arith.constant 6 : index
    %7 = memref.load %arg1[%c6] : memref<25xf32, #tpu.memory_space<smem>>
    %c7 = arith.constant 7 : index
    %8 = memref.load %arg1[%c7] : memref<25xf32, #tpu.memory_space<smem>>
    %c8 = arith.constant 8 : index
    %9 = memref.load %arg1[%c8] : memref<25xf32, #tpu.memory_space<smem>>
    %c9 = arith.constant 9 : index
    %10 = memref.load %arg1[%c9] : memref<25xf32, #tpu.memory_space<smem>>
    %c10 = arith.constant 10 : index
    %11 = memref.load %arg1[%c10] : memref<25xf32, #tpu.memory_space<smem>>
    %c11 = arith.constant 11 : index
    %12 = memref.load %arg1[%c11] : memref<25xf32, #tpu.memory_space<smem>>
    %c12 = arith.constant 12 : index
    %13 = memref.load %arg1[%c12] : memref<25xf32, #tpu.memory_space<smem>>
    %c13 = arith.constant 13 : index
    %14 = memref.load %arg1[%c13] : memref<25xf32, #tpu.memory_space<smem>>
    %c14 = arith.constant 14 : index
    %15 = memref.load %arg1[%c14] : memref<25xf32, #tpu.memory_space<smem>>
    %c15 = arith.constant 15 : index
    %16 = memref.load %arg1[%c15] : memref<25xf32, #tpu.memory_space<smem>>
    %c16 = arith.constant 16 : index
    %17 = memref.load %arg1[%c16] : memref<25xf32, #tpu.memory_space<smem>>
    %c17 = arith.constant 17 : index
    %18 = memref.load %arg1[%c17] : memref<25xf32, #tpu.memory_space<smem>>
    %c18 = arith.constant 18 : index
    %19 = memref.load %arg1[%c18] : memref<25xf32, #tpu.memory_space<smem>>
    %c19 = arith.constant 19 : index
    %20 = memref.load %arg1[%c19] : memref<25xf32, #tpu.memory_space<smem>>
    %c20 = arith.constant 20 : index
    %21 = memref.load %arg1[%c20] : memref<25xf32, #tpu.memory_space<smem>>
    %c21 = arith.constant 21 : index
    %22 = memref.load %arg1[%c21] : memref<25xf32, #tpu.memory_space<smem>>
    %c22 = arith.constant 22 : index
    %23 = memref.load %arg1[%c22] : memref<25xf32, #tpu.memory_space<smem>>
    %c23 = arith.constant 23 : index
    %24 = memref.load %arg1[%c23] : memref<25xf32, #tpu.memory_space<smem>>
    %c24 = arith.constant 24 : index
    %25 = memref.load %arg1[%c24] : memref<25xf32, #tpu.memory_space<smem>>
    %26 = vector.broadcast %1 : f32 to vector<8x128xf32>
    %27 = arith.mulf %0, %26 : vector<8x128xf32>
    %28 = vector.broadcast %9 : f32 to vector<8x128xf32>
    %29 = arith.addf %27, %28 : vector<8x128xf32>
    %cst = arith.constant 0.000000e+00 : f32
    %30 = vector.broadcast %cst : f32 to vector<8x128xf32>
    %31 = arith.maximumf %29, %30 : vector<8x128xf32>
    %32 = vector.broadcast %17 : f32 to vector<8x128xf32>
    %33 = arith.mulf %31, %32 : vector<8x128xf32>
    %34 = vector.broadcast %2 : f32 to vector<8x128xf32>
    %35 = arith.mulf %0, %34 : vector<8x128xf32>
    %36 = vector.broadcast %10 : f32 to vector<8x128xf32>
    %37 = arith.addf %35, %36 : vector<8x128xf32>
    %cst_2 = arith.constant 0.000000e+00 : f32
    %38 = vector.broadcast %cst_2 : f32 to vector<8x128xf32>
    %39 = arith.maximumf %37, %38 : vector<8x128xf32>
    %40 = vector.broadcast %18 : f32 to vector<8x128xf32>
    %41 = arith.mulf %39, %40 : vector<8x128xf32>
    %42 = arith.addf %33, %41 : vector<8x128xf32>
    %43 = vector.broadcast %3 : f32 to vector<8x128xf32>
    %44 = arith.mulf %0, %43 : vector<8x128xf32>
    %45 = vector.broadcast %11 : f32 to vector<8x128xf32>
    %46 = arith.addf %44, %45 : vector<8x128xf32>
    %cst_3 = arith.constant 0.000000e+00 : f32
    %47 = vector.broadcast %cst_3 : f32 to vector<8x128xf32>
    %48 = arith.maximumf %46, %47 : vector<8x128xf32>
    %49 = vector.broadcast %19 : f32 to vector<8x128xf32>
    %50 = arith.mulf %48, %49 : vector<8x128xf32>
    %51 = arith.addf %42, %50 : vector<8x128xf32>
    %52 = vector.broadcast %4 : f32 to vector<8x128xf32>
    %53 = arith.mulf %0, %52 : vector<8x128xf32>
    %54 = vector.broadcast %12 : f32 to vector<8x128xf32>
    %55 = arith.addf %53, %54 : vector<8x128xf32>
    %cst_4 = arith.constant 0.000000e+00 : f32
    %56 = vector.broadcast %cst_4 : f32 to vector<8x128xf32>
    %57 = arith.maximumf %55, %56 : vector<8x128xf32>
    %58 = vector.broadcast %20 : f32 to vector<8x128xf32>
    %59 = arith.mulf %57, %58 : vector<8x128xf32>
    %60 = arith.addf %51, %59 : vector<8x128xf32>
    %61 = vector.broadcast %5 : f32 to vector<8x128xf32>
    %62 = arith.mulf %0, %61 : vector<8x128xf32>
    %63 = vector.broadcast %13 : f32 to vector<8x128xf32>
    %64 = arith.addf %62, %63 : vector<8x128xf32>
    %cst_5 = arith.constant 0.000000e+00 : f32
    %65 = vector.broadcast %cst_5 : f32 to vector<8x128xf32>
    %66 = arith.maximumf %64, %65 : vector<8x128xf32>
    %67 = vector.broadcast %21 : f32 to vector<8x128xf32>
    %68 = arith.mulf %66, %67 : vector<8x128xf32>
    %69 = arith.addf %60, %68 : vector<8x128xf32>
    %70 = vector.broadcast %6 : f32 to vector<8x128xf32>
    %71 = arith.mulf %0, %70 : vector<8x128xf32>
    %72 = vector.broadcast %14 : f32 to vector<8x128xf32>
    %73 = arith.addf %71, %72 : vector<8x128xf32>
    %cst_6 = arith.constant 0.000000e+00 : f32
    %74 = vector.broadcast %cst_6 : f32 to vector<8x128xf32>
    %75 = arith.maximumf %73, %74 : vector<8x128xf32>
    %76 = vector.broadcast %22 : f32 to vector<8x128xf32>
    %77 = arith.mulf %75, %76 : vector<8x128xf32>
    %78 = arith.addf %69, %77 : vector<8x128xf32>
    %79 = vector.broadcast %7 : f32 to vector<8x128xf32>
    %80 = arith.mulf %0, %79 : vector<8x128xf32>
    %81 = vector.broadcast %15 : f32 to vector<8x128xf32>
    %82 = arith.addf %80, %81 : vector<8x128xf32>
    %cst_7 = arith.constant 0.000000e+00 : f32
    %83 = vector.broadcast %cst_7 : f32 to vector<8x128xf32>
    %84 = arith.maximumf %82, %83 : vector<8x128xf32>
    %85 = vector.broadcast %23 : f32 to vector<8x128xf32>
    %86 = arith.mulf %84, %85 : vector<8x128xf32>
    %87 = arith.addf %78, %86 : vector<8x128xf32>
    %88 = vector.broadcast %8 : f32 to vector<8x128xf32>
    %89 = arith.mulf %0, %88 : vector<8x128xf32>
    %90 = vector.broadcast %16 : f32 to vector<8x128xf32>
    %91 = arith.addf %89, %90 : vector<8x128xf32>
    %cst_8 = arith.constant 0.000000e+00 : f32
    %92 = vector.broadcast %cst_8 : f32 to vector<8x128xf32>
    %93 = arith.maximumf %91, %92 : vector<8x128xf32>
    %94 = vector.broadcast %24 : f32 to vector<8x128xf32>
    %95 = arith.mulf %93, %94 : vector<8x128xf32>
    %96 = arith.addf %87, %95 : vector<8x128xf32>
    %97 = vector.broadcast %25 : f32 to vector<8x128xf32>
    %98 = arith.addf %96, %97 : vector<8x128xf32>
    %c0_9 = arith.constant 0 : index
    %c0_10 = arith.constant 0 : index
    %99 = vector.load %arg3[%c0_9, %c0_10] : memref<8x128xf32, #tpu.memory_space<vmem>>, vector<8x128xf32>
    tpu.vector_store %arg3[%c0_9, %c0_10], %98 {strides = array<i32>} : memref<8x128xf32, #tpu.memory_space<vmem>>, vector<8x128xf32>,
    return
  }
  func.func @transform_0(%arg0: i32) -> i32 {
    %c0_i32 = arith.constant 0 : i32
    %c0_i32_0 = arith.constant 0 : i32
    return %c0_i32 : i32
  }
  func.func @transform_1(%arg0: i32) -> (i32, i32) {
    %c0_i32 = arith.constant 0 : i32
    %c0_i32_0 = arith.constant 0 : i32
    return %arg0, %c0_i32 : i32, i32
  }
  func.func @transform_2(%arg0: i32) -> (i32, i32) {
    %c0_i32 = arith.constant 0 : i32
    %c0_i32_0 = arith.constant 0 : i32
    return %arg0, %c0_i32 : i32, i32
  }
}

</mosaic_0001>

<bundles_post_ra>
// kernel: tpu_custom_call.1
= control target key start
LH: loop header
LB: loop body
LE: loop exit
PB: predicated region body
PF: predicated region fallthrough
CT: control target
= control target key end

     0   :  { %7 = vsyncpa [#allocation5], 0  ;;  %s269_s0 = inlined_call_operand.hbm [shape: f32[25], index: 0, kind: input, shape index: {}]   ;;  %s270_s1 = inlined_call_operand.hbm [shape: f32[8,128], index: 1, kind: input, shape index: {}]   ;;  %s271_s2 = inlined_call_operand.hbm [shape: f32[8,128], index: 2, kind: output, shape index: {}]  }
   0x1   :  { %8 = vsyncpa [#allocation3], 0 }
   0x2   :  { %9 = vsyncpa [#allocation4], 0  ;;  %s224_s9 = smov [#allocation2]   ;;  %s225_s12 = smov [#allocation6]  }
   0x3   :  { %17 = dma.hbm_to_smem %s269_s0, 16, %s224_s9, [#allocation5]  }
   0x4   :  { %s24_s13 = sshll.u32 %s225_s12, 4  ;;  %s25_s13 = int_to_ptr.vmem [resolvable:$true] %s24_s13 }
   0x5   :  { %s186_s14 = scalar_lea.vmem %s25_s13, 128  ;;  %p191_p1 = scmp.lt.s32.totalorder %s25_s13, %s25_s13 }
   0x6   :  { %p187_p0 = scmp.ne.s32.totalorder %s25_s13, %s186_s14  ;;  %p192_p2 = scmp.lt.s32.totalorder %s186_s14, %s186_s14 }
   0x8   :  { %p193_p3 = por %p192_p2, %p191_p1 }
   0xa   :  { %p194_p4 = pnand %p193_p3, %p187_p0 }
   0xc   :  { %197 = shalt.err (!%p194_p4)
}
   0xd   :  { %27 = dma.hbm_to_vmem [thread:$0]  %s270_s1, 128, %s25_s13, [#allocation3]  }
   0xe   :  { %218 = dma.done.wait [#allocation5], 16  }
   0xf   :  { %219 = vsyncadd [#allocation5], 4294967280 }
  0x10   :  { %220 = dma.done.wait [#allocation3], 128  }
  0x11   :  { %221 = vsyncadd [#allocation3], 4294967168 }
  0x12   :  { %34 = sfence }
  0x13   :  { %s36_s0 = sld [smem:[#allocation2]]  ;;  %v35_v0 = vld [vmem:[#allocation6] sm:$0xff]  ;;  %s226_s12 = smov [#allocation7]  }
  0x14   :  { %s143_s17 = sld [smem:[#allocation2 + $0x1]]  ;;  %s133_s13 = sshll.u32 %s226_s12, 4  ;;  %s134_s13 = int_to_ptr.vmem [resolvable:$true] %s133_s13 }
  0x15   :  { %s144_s18 = sld [smem:[#allocation2 + $0x2]]  ;;  %s198_s14 = scalar_lea.vmem %s134_s13, 128 }
  0x16   :  { %s145_s19 = sld [smem:[#allocation2 + $0x3]]  ;;  %p199_p5 = scmp.ne.s32.totalorder %s134_s13, %s198_s14 }
  0x17   :  { %s146_s20 = sld [smem:[#allocation2 + $0x4]]  ;;  %p203_p6 = scmp.lt.s32.totalorder %s134_s13, %s134_s13 }
  0x18   :  { %s248_s21 = sld [smem:[#allocation2 + $0x5]]  ;;  %p204_p7 = scmp.lt.s32.totalorder %s198_s14, %s198_s14 }
  0x19   :  { %s250_s22 = sld [smem:[#allocation2 + $0x6]]  ;;  %v61_v1 = vstv %s36_s0 }
  0x1a   :  { %s252_s23 = sld [smem:[#allocation2 + $0x7]]  ;;  %v68_v2 = vstv %s143_s17  ;;  %v62_v4 = vmul.f32 %v61_v1, %v35_v0  ;;  %p205_p8 = por %p204_p7, %p203_p6 }
  0x1b   :  { %s150_s24 = sld [smem:[#allocation2 + $0x8]]  ;;  %v76_v3 = vstv %s144_s18  ;;  %v69_v6 = vmul.f32 %v68_v2, %v35_v0 }
  0x1c   :  { %s151_s1 = sld [smem:[#allocation2 + $0x9]]  ;;  %v84_v5 = vstv %s145_s19  ;;  %v77_v7 = vmul.f32 %v76_v3, %v35_v0  ;;  %p206_p9 = pnand %p205_p8, %p199_p5 }
  0x1d   :  { %s152_s25 = sld [smem:[#allocation2 + $0xa]]  ;;  %v92_v8 = vstv %s146_s20  ;;  %v85_v10 = vmul.f32 %v84_v5, %v35_v0 }
  0x1e   :  { %s153_s26 = sld [smem:[#allocation2 + $0xb]]  ;;  %v100_v11 = vstv %s248_s21  ;;  %v93_v16 = vmul.f32 %v92_v8, %v35_v0 }
  0x1f   :  { %s154_s27 = sld [smem:[#allocation2 + $0xc]]  ;;  %v101_v19 = vmul.f32 %v100_v11, %v35_v0  ;;  %v108_v20 = vstv %s250_s22 }
  0x20   :  { %s254_s28 = sld [smem:[#allocation2 + $0xd]]  ;;  %v116_v25 = vstv %s252_s23  ;;  %v109_v28 = vmul.f32 %v108_v20, %v35_v0 }
  0x21   :  { %s256_s29 = sld [smem:[#allocation2 + $0xe]]  ;;  %v63_v9 = vstv %s150_s24  ;;  %v117_v34 = vmul.f32 %v116_v25, %v35_v0 }
  0x22   :  { %s259_s30 = sld [smem:[#allocation2 + $0xf]]  ;;  %v64_v12 = vadd.f32 %v63_v9, %v62_v4  ;;  %v70_v13 = vstv %s151_s1 }
  0x23   :  { %s158_s3 = sld [smem:[#allocation2 + $0x10]]  ;;  %v71_v14 = vadd.f32 %v70_v13, %v69_v6  ;;  %v78_v15 = vstv %s152_s25 }
  0x24   :  { %s159_s4 = sld [smem:[#allocation2 + $0x11]]  ;;  %v79_v17 = vadd.f32 %v78_v15, %v77_v7  ;;  %v86_v18 = vstv %s153_s26  ;;  %v65_v23 = vmax.f32 %v64_v12, 0.0 }
  0x25   :  { %s160_s5 = sld [smem:[#allocation2 + $0x12]]  ;;  %v87_v21 = vadd.f32 %v86_v18, %v85_v10  ;;  %v94_v22 = vstv %s154_s27  ;;  %v72_v26 = vmax.f32 %v71_v14, 0.0 }
  0x26   :  { %s161_s6 = sld [smem:[#allocation2 + $0x13]]  ;;  %v102_v24 = vstv %s254_s28  ;;  %v95_v27 = vadd.f32 %v94_v22, %v93_v16  ;;  %v80_v29 = vmax.f32 %v79_v17, 0.0 }
  0x27   :  { %s162_s7 = sld [smem:[#allocation2 + $0x14]]  ;;  %v103_v30 = vadd.f32 %v102_v24, %v101_v19  ;;  %v110_v31 = vstv %s256_s29  ;;  %v88_v33 = vmax.f32 %v87_v21, 0.0 }
  0x28   :  { %s163_s8 = sld [smem:[#allocation2 + $0x15]]  ;;  %v118_v37 = vstv %s259_s30  ;;  %v96_v40 = vmax.f32 %v95_v27, 0.0  ;;  %v111_v41 = vadd.f32 %v110_v31, %v109_v28 }
  0x29   :  { %s164_s9 = sld [smem:[#allocation2 + $0x16]]  ;;  %v66_v32 = vstv %s158_s3  ;;  %v104_v44 = vmax.f32 %v103_v30, 0.0  ;;  %v119_v48 = vadd.f32 %v118_v37, %v117_v34 }
  0x2a   :  { %s165_s10 = sld [smem:[#allocation2 + $0x17]]  ;;  %v67_v35 = vmul.f32 %v66_v32, %v65_v23  ;;  %v73_v36 = vstv %s159_s4  ;;  %v112_v52 = vmax.f32 %v111_v41, 0.0 }
  0x2b   :  { %v74_v38 = vmul.f32 %v73_v36, %v72_v26  ;;  %v81_v39 = vstv %s160_s5  ;;  %s166_s11 = sld [smem:[#allocation2 + $0x18]]  ;;  %v120_v56 = vmax.f32 %v119_v48, 0.0 }
  0x2c   :  { %v82_v42 = vmul.f32 %v81_v39, %v80_v29  ;;  %v89_v43 = vstv %s161_s6 }
  0x2d   :  { %v75_v45 = vadd.f32 %v74_v38, %v67_v35  ;;  %v90_v46 = vmul.f32 %v89_v43, %v88_v33  ;;  %v97_v47 = vstv %s162_s7 }
  0x2e   :  { %v105_v49 = vstv %s163_s8  ;;  %v98_v51 = vmul.f32 %v97_v47, %v96_v40 }
  0x2f   :  { %v83_v50 = vadd.f32 %v82_v42, %v75_v45  ;;  %v113_v53 = vstv %s164_s9  ;;  %v106_v55 = vmul.f32 %v105_v49, %v104_v44 }
  0x30   :  { %v121_v57 = vstv %s165_s10  ;;  %v114_v59 = vmul.f32 %v113_v53, %v112_v52 }
  0x31   :  { %v91_v54 = vadd.f32 %v90_v46, %v83_v50  ;;  %v122_v61 = vmul.f32 %v121_v57, %v120_v56  ;;  %v124_v63 = vstv %s166_s11 }
  0x33   :  { %v99_v58 = vadd.f32 %v98_v51, %v91_v54 }
  0x35   :  { %v107_v60 = vadd.f32 %v106_v55, %v99_v58 }
  0x37   :  { %v115_v62 = vadd.f32 %v114_v59, %v107_v60 }
  0x39   :  { %v123_v0 = vadd.f32 %v122_v61, %v115_v62 }
  0x3b   :  { %v125_v1 = vadd.f32 %v124_v63, %v123_v0 }
  0x3d   :  { %126 = vst [vmem:[#allocation7] sm:$0xff] %v125_v1 }
  0x3e   :  { %209 = shalt.err (!%p206_p9)
}
  0x3f   :  { %136 = dma.vmem_to_hbm [thread:$0]  %s134_s13, 128, %s271_s2, [#allocation4]  }
  0x40   :  { %222 = dma.done.wait [#allocation4], 128  }
  0x41   :  { %223 = vsyncadd [#allocation4], 4294967168 }
  0x42   :  { %140 = vsyncpa [#allocation3], 1 }
  0x43   :  { %141 = vsyncpa [#allocation4], 1 }
  0x44   :  { %142 = vsyncpa [#allocation5], 1 }

</bundles_post_ra>
